<compile_context>
chip_gen: v7x
topology: tpu7x:2x2x1
jax: 0.10.0
libtpu: 0.0.40
codegen_flags: <defaults>
</compile_context>

<pallas_src>
import functools
import math

import jax
import jax.numpy as jnp
from jax.experimental import pallas as pl
from jax.experimental.pallas import tpu as pltpu


def _round_up(a: int, m: int) -> int:
    return ((a + m - 1) // m) * m


def _sinusoidal_kernel(tab_ref, x_ref, o_ref):
    # tab_ref: (2, dim_p) f32 -- row 0: freqs (0 on pad lanes),
    #                           row 1: phase (0 on sin lanes, pi/2 on cos lanes)
    # x_ref:   (TILE_B, 1) f32 -- timesteps tile
    # o_ref:   (TILE_B, dim_p) out dtype
    x = x_ref[...]                         # (TILE_B, 1)
    freq = tab_ref[0:1, :]                 # (1, dim_p)
    phase = tab_ref[1:2, :]                # (1, dim_p)
    # VPU broadcast-multiply + add, single EUP/VPU sin pass, one lane-dense store.
    o_ref[...] = jnp.sin(x * freq + phase).astype(o_ref.dtype)


def _vmem_estimate(tile_rows: int, dim_p: int, out_bytes: int) -> int:
    out_buf = 2 * tile_rows * dim_p * out_bytes      # double-buffered output tile
    x_buf = 2 * tile_rows * 128 * 4                  # (tile_b,1) lane-padded to 128
    tab_buf = 2 * 8 * dim_p * 4                      # (2,dim_p) sublane-padded to 8
    temps = 2 * tile_rows * dim_p * 4                # ang + sin result (f32)
    return out_buf + x_buf + tab_buf + temps


def _choose_tile_rows(b8: int, dim_p: int, out_bytes: int,
                      budget: int = 12 * 1024 * 1024) -> int:
    """Pick tile rows = 8*d where d divides b8//8, the tile fits `budget`,
    and the grid has >= 2 steps whenever possible (megacore + writeback overlap)."""
    m = b8 // 8
    divs = set()
    i = 1
    while i * i <= m:
        if m % i == 0:
            divs.add(i)
            divs.add(m // i)
        i += 1
    best = 1
    for d in sorted(divs):
        steps = m // d
        if m >= 2 and steps < 2:
            continue                       # keep >= 2 grid steps when we can
        if _vmem_estimate(8 * d, dim_p, out_bytes) > budget:
            continue
        best = max(best, d)
    return 8 * best


def sinusoidal_pos_emb(x: jax.Array, dim: int, *, out_dtype=jnp.float32) -> jax.Array:
    """x: (B,) timesteps -> (B, dim) sinusoidal embeddings (sin | cos)."""
    assert dim % 2 == 0 and dim >= 4, "dim must be even and >= 4"
    half_dim = dim // 2
    b = x.shape[0]
    out_bytes = jnp.dtype(out_dtype).itemsize

    # Lane-dense output width (multiple of 128); pad lanes (freq=0, phase=0) are sliced off.
    dim_p = _round_up(dim, 128)

    # Batch tiling: multiple of 8, divides the 8-row-padded batch exactly
    # (so b_p == round_up(b, 8), and the trailing slice is a no-op when b % 8 == 0),
    # grid >= 2 steps whenever possible, tile capped at ~12 MiB of VMEM.
    b8 = _round_up(b, 8)
    tile_b = _choose_tile_rows(b8, dim_p, out_bytes)
    b_p = b8                      # guaranteed: tile_b divides b8
    grid = (b_p // tile_b,)

    # Timesteps as a (B_p, 1) f32 column (zero-padded rows sliced off).
    x2d = x.reshape(b, 1).astype(jnp.float32)
    if b_p != b:
        x2d = jnp.pad(x2d, ((0, b_p - b), (0, 0)))

    # Hoisted frequency + phase table, computed once outside the grid.
    scale = math.log(10000.0) / (half_dim - 1)
    base = jnp.exp(jnp.arange(half_dim, dtype=jnp.float32) * -scale)     # (half_dim,)
    pad = jnp.zeros((dim_p - dim,), jnp.float32)
    freq_row = jnp.concatenate([base, base, pad])                        # (dim_p,)
    phase_row = jnp.concatenate([jnp.zeros((half_dim,), jnp.float32),
                                 jnp.full((half_dim,), math.pi / 2.0, jnp.float32),
                                 pad])                                   # (dim_p,)
    table = jnp.stack([freq_row, phase_row], axis=0)                     # (2, dim_p)

    vmem_limit = min(32 * 1024 * 1024,
                     max(16 * 1024 * 1024,
                         2 * _vmem_estimate(tile_b, dim_p, out_bytes)))

    out = pl.pallas_call(
        _sinusoidal_kernel,
        out_shape=jax.ShapeDtypeStruct((b_p, dim_p), out_dtype),
        grid=grid,
        in_specs=[
            pl.BlockSpec((2, dim_p), lambda i: (0, 0)),     # freq/phase: VMEM-resident
            pl.BlockSpec((tile_b, 1), lambda i: (i, 0)),    # x tile
        ],
        out_specs=pl.BlockSpec((tile_b, dim_p), lambda i: (i, 0)),
        compiler_params=pltpu.CompilerParams(
            dimension_semantics=("parallel",),
            vmem_limit_bytes=vmem_limit),
    )(table, x2d)

    if b_p != b or dim_p != dim:
        out = out[:b, :dim]
    return out


def _reference(x: jax.Array, dim: int) -> jax.Array:
    half_dim = dim // 2
    emb = math.log(10000.0) / (half_dim - 1)
    emb = jnp.exp(jnp.arange(half_dim, dtype=jnp.float32) * -emb)
    emb = x[:, None].astype(jnp.float32) * emb[None, :]
    return jnp.concatenate([jnp.sin(emb), jnp.cos(emb)], axis=-1)


if __name__ == "__main__":
    # Case 1: small dim (< 128 -> lane padding path), batch multiple of 8 (no slices).
    batch, dim = 8, 32
    x = jax.random.uniform(jax.random.PRNGKey(0), (batch,), dtype=jnp.float32) * 1000.0
    out = jax.block_until_ready(sinusoidal_pos_emb(x, dim))
    ref = _reference(x, dim)
    assert out.shape == (batch, dim), out.shape
    # cos computed as sin(t + pi/2): allow a few 1e-4 from f32 range reduction at t ~ 1e3.
    assert jnp.allclose(out, ref, atol=1e-3, rtol=1e-3), "mismatch (dim=32)"

    # Case 2: lane-dense dim (dim % 128 == 0), ragged batch (exercises batch padding path).
    batch2, dim2 = 20, 256
    x2 = jax.random.uniform(jax.random.PRNGKey(1), (batch2,), dtype=jnp.float32) * 1000.0
    out2 = jax.block_until_ready(sinusoidal_pos_emb(x2, dim2))
    ref2 = _reference(x2, dim2)
    assert out2.shape == (batch2, dim2), out2.shape
    assert jnp.allclose(out2, ref2, atol=1e-3, rtol=1e-3), "mismatch (dim=256)"

    print("KERNEL_OK")
</pallas_src>

<mosaic_0001>
module attributes {stable_mosaic.version = 11 : i64} {
  func.func @_sinusoidal_kernel(%arg0: i32, %arg1: memref<2x128xf32, #tpu.memory_space<vmem>>, %arg2: memref<8x1xf32, #tpu.memory_space<vmem>>, %arg3: memref<8x128xf32, #tpu.memory_space<vmem>>) attributes {dimension_semantics = [#tpu.dimension_semantics<parallel>], iteration_bounds = array<i64: 1>, scalar_prefetch = 0 : i64, scratch_operands = 0 : i64, tpu.core_type = #tpu.core_type<tc>, window_params = [{pipeline_mode = #tpu.pipeline_mode<synchronous>, transform_indices = @transform_0, window_bounds = array<i64: 2, 128>}, {transform_indices = @transform_1, window_bounds = array<i64: 8, 1>}, {transform_indices = @transform_2, window_bounds = array<i64: 8, 128>}]} {
    %c0 = arith.constant 0 : index
    %c0_0 = arith.constant 0 : index
    %0 = vector.load %arg2[%c0, %c0_0] : memref<8x1xf32, #tpu.memory_space<vmem>>, vector<8x1xf32>
    %c0_1 = arith.constant 0 : index
    %c0_2 = arith.constant 0 : index
    %1 = vector.load %arg1[%c0_1, %c0_2] : memref<2x128xf32, #tpu.memory_space<vmem>>, vector<1x128xf32>
    %c1 = arith.constant 1 : index
    %c0_3 = arith.constant 0 : index
    %2 = vector.load %arg1[%c1, %c0_3] : memref<2x128xf32, #tpu.memory_space<vmem>>, vector<1x128xf32>
    %3 = vector.broadcast %0 : vector<8x1xf32> to vector<8x128xf32>
    %4 = vector.broadcast %1 : vector<1x128xf32> to vector<8x128xf32>
    %5 = arith.mulf %3, %4 : vector<8x128xf32>
    %6 = vector.broadcast %2 : vector<1x128xf32> to vector<8x128xf32>
    %7 = arith.addf %5, %6 : vector<8x128xf32>
    %8 = math.sin %7 : vector<8x128xf32>
    %c0_4 = arith.constant 0 : index
    %c0_5 = arith.constant 0 : index
    %9 = vector.load %arg3[%c0_4, %c0_5] : memref<8x128xf32, #tpu.memory_space<vmem>>, vector<8x128xf32>
    tpu.vector_store %arg3[%c0_4, %c0_5], %8 {strides = array<i32>} : memref<8x128xf32, #tpu.memory_space<vmem>>, vector<8x128xf32>,
    return
  }
  func.func @transform_0(%arg0: i32) -> (i32, i32) {
    %c0_i32 = arith.constant 0 : i32
    %c0_i32_0 = arith.constant 0 : i32
    %c0_i32_1 = arith.constant 0 : i32
    return %c0_i32, %c0_i32_0 : i32, i32
  }
  func.func @transform_1(%arg0: i32) -> (i32, i32) {
    %c0_i32 = arith.constant 0 : i32
    %c0_i32_0 = arith.constant 0 : i32
    return %arg0, %c0_i32 : i32, i32
  }
  func.func @transform_2(%arg0: i32) -> (i32, i32) {
    %c0_i32 = arith.constant 0 : i32
    %c0_i32_0 = arith.constant 0 : i32
    return %arg0, %c0_i32 : i32, i32
  }
}

</mosaic_0001>

<bundles_post_ra>
// kernel: tpu_custom_call.1
= control target key start
LH: loop header
LB: loop body
LE: loop exit
PB: predicated region body
PF: predicated region fallthrough
CT: control target
= control target key end

     0   :  { %v196_v1 = vmov 0   ;;  %s261_s0 = inlined_call_operand.vmem [shape: f32[2,128], index: 0, kind: input, shape index: {}]   ;;  %s262_s1 = inlined_call_operand.vmem [shape: f32[8,1], index: 1, kind: input, shape index: {}]   ;;  %s263_s2 = inlined_call_operand.hbm [shape: f32[8,128], index: 2, kind: output, shape index: {}]  }
   0x1   :  { %v12_v0 = vld [vmem:[%s262_s1] sm:$0xff]  ;;  %167 = vset.pattern.permute.xlu0 %v196_v1 }
   0x2   :  { %17 = vperm.xlu0 %167, %v12_v0  }
   0x3   :  { %7 = vsyncpa [#allocation3], 0  ;;  %v149_v2 = vld [vmem:[%s261_s0] ss:$0 sm:$0xff]  ;;  %v150_v3 = vld [vmem:[%s261_s0 + $0x1] ss:$0 sm:$0xff] }
   0x4   :  { %v197_v18 = vmov 2102212464   ;;  %v198_v20 = vmov 920167782   ;;  %v199_v24 = vmov 1326507024  }
   0x5   :  { %v200_v26 = vmov 683565275   ;;  %v201_v28 = vmov 2475754826   ;;  %v202_v31 = vmov 2131351028  }
   0x6   :  { %s203_s0 = smov [#allocation2]  }
   0x7   :  { %s141_s1 = sshll.u32 %s203_s0, 4  ;;  %s142_s1 = int_to_ptr.vmem [resolvable:$true] %s141_s1 }
   0x8   :  { %s172_s15 = scalar_lea.vmem %s142_s1, 128  ;;  %p177_p1 = scmp.lt.s32.totalorder %s142_s1, %s142_s1 }
   0x9   :  { %p173_p0 = scmp.ne.s32.totalorder %s142_s1, %s172_s15  ;;  %p178_p2 = scmp.lt.s32.totalorder %s172_s15, %s172_s15 }
   0xb   :  { %p179_p3 = por %p178_p2, %p177_p1 }
   0xd   :  { %p180_p4 = pnand %p179_p3, %p173_p0 }
  0x81   :  { %v18_v4 = vpop.permute.xlu0 %17 }
  0x82   :  { %v24_v5 = vmul.f32 %v149_v2, %v18_v4 }
  0x84   :  { %v228_v6 = vadd.f32 %v150_v3, %v24_v5 }
  0x86   :  { %v33_v7 = vand.u32 2139095040, %v228_v6  ;;  %v30_v8 = vand.u32 2147483647, %v228_v6  ;;  %vm32_vm7 = vcmp.lt.s32.totalorder %v228_v6, 0  ;;  %vm122_vm12 = vweird.f32 %v228_v6 }
  0x88   :  { %v34_v9 = vshrl.u32 %v33_v7, 23  ;;  %v37_v11 = vand.u32 8388607, %v30_v8  ;;  %vm31_vm8 = vcmp.le.f32.partialorder %v30_v8, 0.7853982 }
  0x8a   :  { %v151_v10 = vadd.s32 4294967169, %v34_v9  ;;  %v38_v14 = vor.u32 8388608, %v37_v11 }
  0x8c   :  { %v40_v12 = vadd.s32 1, %v151_v10  ;;  %v78_v22 = vshll.u32 %v38_v14, 8 }
  0x8e   :  { %vm41_vm0 = vcmp.gt.s32.totalorder %v40_v12, 0 }
  0x8f   :  { %v42_v13 = vsel %vm41_vm0, %v40_v12, 0 }
  0x90   :  { %v44_v15 = vand.u32 31, %v42_v13  ;;  %v43_v16 = vshrl.u32 %v42_v13, 5 }
  0x92   :  { %v45_v17 = vsub.s32 32, %v44_v15  ;;  %v56_v19 = vshll.u32 %v197_v18, %v44_v15  ;;  %v59_v21 = vshll.u32 %v198_v20, %v44_v15  ;;  %v47_v27 = vshll.u32 %v200_v26, %v44_v15 }
  0x93   :  { %v50_v30 = vshll.u32 %v201_v28, %v44_v15  ;;  %v53_v33 = vshll.u32 %v202_v31, %v44_v15  ;;  %vm65_vm1 = vcmp.lt.s32.totalorder %v43_v16, 4  ;;  %vm62_vm2 = vcmp.lt.s32.totalorder %v43_v16, 1 }
  0x94   :  { %v57_v23 = vshrl.u32 %v198_v20, %v45_v17  ;;  %v60_v25 = vshrl.u32 %v199_v24, %v45_v17  ;;  %v48_v29 = vshrl.u32 %v201_v28, %v45_v17  ;;  %v51_v32 = vshrl.u32 %v202_v31, %v45_v17 }
  0x95   :  { %v54_v34 = vshrl.u32 %v197_v18, %v45_v17  ;;  %v46_v38 = vshrl.u32 %v200_v26, %v45_v17  ;;  %vm63_vm3 = vcmp.lt.s32.totalorder %v43_v16, 2  ;;  %vm64_vm4 = vcmp.lt.s32.totalorder %v43_v16, 3 }
  0x96   :  { %v58_v35 = vor.u32 %v57_v23, %v56_v19  ;;  %v61_v36 = vor.u32 %v60_v25, %v59_v21  ;;  %v49_v37 = vor.u32 %v48_v29, %v47_v27  ;;  %v52_v39 = vor.u32 %v51_v32, %v50_v30 }
  0x97   :  { %v55_v40 = vor.u32 %v54_v34, %v53_v33 }
  0x98   :  { %v71_v41 = vsel %vm65_vm1, %v58_v35, 920167782  ;;  %v75_v42 = vsel %vm65_vm1, %v61_v36, 1326507024  ;;  %v70_v44 = vsel %vm62_vm2, %v49_v37, %v52_v39  ;;  %v66_v47 = vsel %vm62_vm2, %v46_v38, %v49_v37 }
  0x99   :  { %v67_v43 = vsel %vm65_vm1, %v55_v40, 2102212464  ;;  %v72_v45 = vsel %vm64_vm4, %v55_v40, %v71_v41  ;;  %v74_v46 = vsel %vm62_vm2, %v52_v39, %v55_v40  ;;  %v76_v50 = vsel %vm64_vm4, %v58_v35, %v75_v42 }
  0x9a   :  { %v68_v48 = vsel %vm64_vm4, %v52_v39, %v67_v43  ;;  %v73_v49 = vsel %vm63_vm3, %v70_v44, %v72_v45  ;;  %v77_v51 = vsel %vm63_vm3, %v74_v46, %v76_v50 }
  0x9b   :  { %v234_v52 = vmul.u32.u64.low %v78_v22, %v73_v49  ;;  %v235_v53 = vmul.u32.u64.high %v78_v22, %v73_v49, %v234_v52  ;;  %v237_v54 = vmul.u32.u64.low %v78_v22, %v77_v51  ;;  %v238_v55 = vmul.u32.u64.high %v78_v22, %v77_v51, %v237_v54 }
  0x9c   :  { %v69_v56 = vsel %vm63_vm3, %v66_v47, %v68_v48 }
  0x9d   :  { %v88_v57 = vadd.s32 1, %v235_v53  ;;  %v85_v58 = vmul.u32 %v78_v22, %v69_v56  ;;  %vm87_vm5 = vc.u32 %v238_v55, %v234_v52  ;;  %v86_v7 = vadd.s32 %v234_v52, %v238_v55 }
  0x9f   :  { %v89_v59 = vsel %vm87_vm5, %v88_v57, %v235_v53 }
  0xa0   :  { %v90_v60 = vadd.s32 %v89_v59, %v85_v58 }
  0xa2   :  { %v91_v61 = vadd.s32 536870912, %v90_v60 }
  0xa4   :  { %v92_v62 = vshrl.u32 %v91_v61, 30 }
  0xa6   :  { %v93_v63 = vshll.u32 %v92_v62, 30  ;;  %v116_v20 = vsub.s32 4, %v92_v62 }
  0xa8   :  { %v94_v0 = vsub.s32 %v90_v60, %v93_v63  ;;  %v117_v23 = vsel %vm32_vm7, %v116_v20, %v92_v62 }
  0xa9   :  { %v119_v25 = vsel %vm31_vm8, 0, %v117_v23 }
  0xaa   :  { %v96_v1 = vsub.s32 0, %v94_v0  ;;  %v123_v26 = vadd.s32 3, %v119_v25 }
  0xac   :  { %v152_v2 = vmin.u32 %v96_v1, %v94_v0  ;;  %v124_v27 = vand.u32 3, %v123_v26 }
  0xae   :  { %v98_v3 = vclz %v152_v2  ;;  %vm129_vm9 = vcmp.eq.s32.totalorder %v124_v27, 2  ;;  %vm126_vm10 = vcmp.eq.s32.totalorder %v124_v27, 0  ;;  %vm125_vm11 = vcmp.lt.s32.totalorder %v124_v27, 2 }
  0xb0   :  { %v153_v4 = vadd.s32 4294967294, %v98_v3 }
  0xb2   :  { %vm154_vm6 = vcmp.lt.s32.totalorder %v153_v4, 0 }
  0xb3   :  { %v101_v5 = vsel %vm154_vm6, 0, %v153_v4 }
  0xb4   :  { %v102_v9 = vsub.s32 32, %v101_v5  ;;  %v106_v10 = vsub.s32 4294967266, %v101_v5  ;;  %v103_v11 = vshll.u32 %v94_v0, %v101_v5 }
  0xb6   :  { %v104_v12 = vshrl.u32 %v86_v7, %v102_v9  ;;  %v107_v13 = vadd.s32 127, %v106_v10 }
  0xb8   :  { %v105_v14 = vor.u32 %v104_v12, %v103_v11  ;;  %v108_v15 = vshll.u32 %v107_v13, 23 }
  0xba   :  { %v109_v16 = vor.u32 4788187, %v108_v15  ;;  %v112_v18 = vcvt.s32.f32 %v105_v14 }
  0xbc   :  { %v110_v17 = vand.u32 2147483647, %v109_v16 }
  0xbe   :  { %v113_v19 = vmul.f32 %v112_v18, %v110_v17 }
  0xc0   :  { %v114_v21 = vxor.u32 2147483648, %v113_v19 }
  0xc2   :  { %v115_v22 = vsel %vm32_vm7, %v114_v21, %v113_v19 }
  0xc3   :  { %v118_v24 = vsel %vm31_vm8, %v228_v6, %v115_v22 }
  0xc4   :  { %168 = vcosq.f32 %v118_v24 }
  0xc5   :  { %170 = vsinq.f32 %v118_v24 }
  0xce   :  { %v169_v28 = vpop.eup %168 }
  0xcf   :  { %v171_v29 = vpop.eup %170  ;;  %v130_v30 = vxor.u32 2147483648, %v169_v28 }
  0xd0   :  { %v127_v31 = vxor.u32 2147483648, %v171_v29 }
  0xd1   :  { %v131_v32 = vsel %vm129_vm9, %v130_v30, %v171_v29 }
  0xd2   :  { %v128_v8 = vsel %vm126_vm10, %v169_v28, %v127_v31 }
  0xd3   :  { %v132_v33 = vsel %vm125_vm11, %v128_v8, %v131_v32 }
  0xd4   :  { %v133_v34 = vsel %vm122_vm12, nan, %v132_v33 }
  0xd5   :  { %134 = vst [vmem:[#allocation2] sm:$0xff] %v133_v34 }
  0xd6   :  { %183 = shalt.err (!%p180_p4)
}
  0xd7   :  { %s184_s18 = scalar_lea.hbm %s263_s2, 128 }
  0xd8   :  { %p185_p5 = scmp.ne.s32.totalorder %s263_s2, %s184_s18  ;;  %p188_p6 = scmp.lt.u32.totalorder %s184_s18, %s263_s2 }
  0xda   :  { %p190_p7 = pnand %p188_p6, %p185_p5 }
  0xdc   :  { %193 = shalt.err (!%p190_p7)
}
  0xdd   :  { %144 = dma.vmem_to_hbm [thread:$0]  %s142_s1, 128, %s263_s2, [#allocation3]  }
  0xde   :  { %194 = dma.done.wait [#allocation3], 128  }
  0xdf   :  { %195 = vsyncadd [#allocation3], 4294967168 }
  0xe0   :  { %148 = vsyncpa [#allocation3], 1 }

</bundles_post_ra>
